<compile_context>
chip_gen: v6e
topology: v6e:2x2x1
jax: 0.10.0
libtpu: 0.0.40
codegen_flags: <defaults>
</compile_context>

<pallas_src>
import functools

import jax
import jax.numpy as jnp
from jax.experimental import pallas as pl
from jax.experimental.pallas import tpu as pltpu


def _round_up(x, m):
    return ((x + m - 1) // m) * m


def _sublane(itemsize):
    # Sub-32-bit dtypes pack along sublanes: f32 -> 8, bf16 -> 16, int8 -> 32.
    return {4: 8, 2: 16, 1: 32}.get(itemsize, 8)


def _tpu_generation_params():
    """Per-generation (target block bytes, physical VMEM bytes, min grid steps)."""
    kind = ""
    try:
        kind = jax.devices()[0].device_kind.lower()
    except Exception:
        pass
    vmem_cap = None
    try:
        vmem_cap = int(pltpu.get_tpu_info().vmem_capacity_bytes)
    except Exception:
        vmem_cap = None

    if ("v5e" in kind) or ("v5 lite" in kind) or ("v5lite" in kind):
        target, cap, min_steps = 3 << 20, (vmem_cap or (128 << 20)), 2
    elif "v7" in kind:
        # Faster HBM but only 64 MiB VMEM and 2 TensorCores.
        target, cap, min_steps = 10 << 20, (vmem_cap or (64 << 20)), 4
    elif "v6" in kind:
        target, cap, min_steps = 12 << 20, (vmem_cap or (128 << 20)), 2
    else:
        target, cap, min_steps = 6 << 20, (vmem_cap or (64 << 20)), 2

    # Never let one (of two double-buffered) input blocks exceed ~30% of VMEM.
    target = min(target, int(0.30 * cap))
    return target, cap, min_steps


def _pick_row_tile(total_rows, hw, itemsize, target_bytes, min_steps):
    """Pick r_tile: a multiple-of-8 divisor of total_rows whose PADDED block fits."""
    sub = _sublane(itemsize)
    lane_bytes = _round_up(hw, 128) * itemsize  # padded bytes per row

    def padded_block_bytes(r):
        return _round_up(r, sub) * lane_bytes

    cands = [r for r in range(8, total_rows + 1, 8) if total_rows % r == 0]
    if not cands:
        # No multiple-of-8 divisor: use the full dim (exempt from the 8-rule).
        return total_rows
    fitting = [r for r in cands if padded_block_bytes(r) <= target_bytes]
    if not fitting:
        # TODO(synk): enormous single-row spatial maps (8 rows already exceed the
        # target) would need an extra H-split reduction grid axis; take the
        # smallest legal tile instead.
        return cands[0]
    # Largest fitting tile that still leaves >= min_steps grid steps (keeps both
    # v7x TensorCores busy and gives the pipeline something to overlap); if the
    # problem is too small for that, just take the largest fitting tile.
    ok = [r for r in fitting if total_rows // r >= min_steps]
    return ok[-1] if ok else fitting[-1]


def _pcb_kernel(x_ref, a_ref, o_ref, *, inv):
    # x_ref: (r_tile, H*W) native dtype; a_ref: (H*W, P) 0/1 stripe membership;
    # o_ref: (r_tile, P). One MXU matmul, f32 accumulation, single store.
    acc = jnp.dot(x_ref[...], a_ref[...], preferred_element_type=jnp.float32)
    o_ref[...] = (acc * inv).astype(o_ref.dtype)


def pcb_splitter(x, num_parts):
    """JAX/Pallas equivalent of PCBSplitter.forward.

    Args:
      x: array of shape (N, C, H, W) (NCHW, like the PyTorch module).
      num_parts: number of horizontal stripes (chunks along H).

    Returns:
      array of shape (N, C, num_parts, 1), same dtype as x.
    """
    N, C, H, W = x.shape
    # TODO(synk): torch.chunk allows uneven stripe sizes when H % num_parts != 0;
    # only the even-split case is implemented here.
    assert H % num_parts == 0, "H must be divisible by num_parts"
    hp = H // num_parts
    hw = H * W
    rows = N * C
    stripe = hp * W
    itemsize = jnp.dtype(x.dtype).itemsize
    sub = _sublane(itemsize)

    target_bytes, vmem_cap, min_steps = _tpu_generation_params()
    r_tile = _pick_row_tile(rows, hw, itemsize, target_bytes, min_steps)
    grid = (rows // r_tile,)

    # Free, contiguous reshape (row-major merge of adjacent dims): no HBM pass.
    x2d = x.reshape(rows, hw)

    # Stripe-membership matrix: avg_mat[l, p] = 1 iff flat spatial index l
    # (h-major) lies in stripe p. 0/1 is exact in any float dtype; the 1/(hp*W)
    # scale is applied once, in f32, inside the kernel.
    avg_mat = (
        jnp.arange(hw, dtype=jnp.int32)[:, None] // stripe
        == jnp.arange(num_parts, dtype=jnp.int32)[None, :]
    ).astype(x.dtype)
    inv = 1.0 / float(stripe)

    # Padded (sublane, lane) VMEM footprint for the scoped-VMEM limit: Pallas
    # double-buffers every operand, and Mosaic pads the last two dims.
    x_blk = _round_up(r_tile, sub) * _round_up(hw, 128) * itemsize
    o_blk = _round_up(r_tile, sub) * _round_up(num_parts, 128) * itemsize
    a_blk = _round_up(hw, sub) * _round_up(num_parts, 128) * itemsize
    need = 2 * (x_blk + o_blk + a_blk) + (2 << 20)  # double buffers + headroom
    vmem_limit = int(min(max(need, 32 << 20), int(0.8 * vmem_cap)))

    kernel = functools.partial(_pcb_kernel, inv=inv)

    pooled = pl.pallas_call(
        kernel,
        out_shape=jax.ShapeDtypeStruct((rows, num_parts), x.dtype),
        grid=grid,
        in_specs=[
            pl.BlockSpec((r_tile, hw), lambda i: (i, 0)),
            pl.BlockSpec((hw, num_parts), lambda i: (0, 0)),
        ],
        out_specs=pl.BlockSpec((r_tile, num_parts), lambda i: (i, 0)),
        compiler_params=pltpu.CompilerParams(
            dimension_semantics=("parallel",),
            vmem_limit_bytes=vmem_limit,
        ),
    )(x2d, avg_mat)

    # (N*C, P) -> (N, C, P, 1): pure metadata reshape, no transpose, no extra pass.
    return pooled.reshape(N, C, num_parts, 1)


if __name__ == "__main__":
    key = jax.random.PRNGKey(0)
    N, C, H, W = 2, 4, 16, 16
    num_parts = 4

    x = jax.random.normal(key, (N, C, H, W), dtype=jnp.float32)

    out = jax.block_until_ready(pcb_splitter(x, num_parts))

    # Reference in plain JAX (same semantics as the PyTorch module).
    hp = H // num_parts
    ref = x.reshape(N, C, num_parts, hp, W).mean(axis=(3, 4))[..., None]
    assert out.shape == (N, C, num_parts, 1), out.shape
    assert out.dtype == x.dtype, out.dtype
    assert jnp.allclose(out.astype(jnp.float32), ref, atol=1e-5, rtol=1e-5), \
        "mismatch vs reference"

    print("KERNEL_OK")
</pallas_src>

<mosaic_0001>
module attributes {stable_mosaic.version = 11 : i64} {
  func.func @_pcb_kernel(%arg0: i32, %arg1: memref<8x256xf32, #tpu.memory_space<vmem>>, %arg2: memref<256x4xf32, #tpu.memory_space<vmem>>, %arg3: memref<8x4xf32, #tpu.memory_space<vmem>>) attributes {dimension_semantics = [#tpu.dimension_semantics<parallel>], iteration_bounds = array<i64: 1>, scalar_prefetch = 0 : i64, scratch_operands = 0 : i64, tpu.core_type = #tpu.core_type<tc>, window_params = [{transform_indices = @transform_0, window_bounds = array<i64: 8, 256>}, {pipeline_mode = #tpu.pipeline_mode<synchronous>, transform_indices = @transform_1, window_bounds = array<i64: 256, 4>}, {transform_indices = @transform_2, window_bounds = array<i64: 8, 4>}]} {
    %c0 = arith.constant 0 : index
    %c0_0 = arith.constant 0 : index
    %0 = vector.load %arg1[%c0, %c0_0] : memref<8x256xf32, #tpu.memory_space<vmem>>, vector<8x256xf32>
    %c0_1 = arith.constant 0 : index
    %c0_2 = arith.constant 0 : index
    %1 = vector.load %arg2[%c0_1, %c0_2] : memref<256x4xf32, #tpu.memory_space<vmem>>, vector<256x4xf32>
    %cst = arith.constant dense<0.000000e+00> : vector<8x4xf32>
    %2 = tpu.matmul %0, %1, %cst {dimension_numbers = #tpu.dot_dimension_numbers<[1], [0], [0], [1], [0, 0, 1, 1], [], []>} : vector<8x256xf32>, vector<256x4xf32>, vector<8x4xf32> -> vector<8x4xf32>
    %cst_3 = arith.constant 1.562500e-02 : f32
    %3 = vector.broadcast %cst_3 : f32 to vector<8x4xf32>
    %4 = arith.mulf %2, %3 : vector<8x4xf32>
    %c0_4 = arith.constant 0 : index
    %c0_5 = arith.constant 0 : index
    %5 = vector.load %arg3[%c0_4, %c0_5] : memref<8x4xf32, #tpu.memory_space<vmem>>, vector<8x4xf32>
    tpu.vector_store %arg3[%c0_4, %c0_5], %4 {strides = array<i32>} : memref<8x4xf32, #tpu.memory_space<vmem>>, vector<8x4xf32>,
    return
  }
  func.func @transform_0(%arg0: i32) -> (i32, i32) {
    %c0_i32 = arith.constant 0 : i32
    %c0_i32_0 = arith.constant 0 : i32
    return %arg0, %c0_i32 : i32, i32
  }
  func.func @transform_1(%arg0: i32) -> (i32, i32) {
    %c0_i32 = arith.constant 0 : i32
    %c0_i32_0 = arith.constant 0 : i32
    %c0_i32_1 = arith.constant 0 : i32
    return %c0_i32, %c0_i32_0 : i32, i32
  }
  func.func @transform_2(%arg0: i32) -> (i32, i32) {
    %c0_i32 = arith.constant 0 : i32
    %c0_i32_0 = arith.constant 0 : i32
    return %arg0, %c0_i32 : i32, i32
  }
}

</mosaic_0001>

<bundles_post_ra>
// kernel: tpu_custom_call.1
= control target key start
LH: loop header
LB: loop body
LE: loop exit
PB: predicated region body
PF: predicated region fallthrough
CT: control target
= control target key end

     0   :  { %vm116_vm0 = vcmask 31744   ;;  %s277_s1 = inlined_call_operand.vmem [shape: f32[256,4], index: 1, kind: input, shape index: {}]   ;;  %s278_s0 = inlined_call_operand.vmem [shape: f32[8,256], index: 0, kind: input, shape index: {}]   ;;  %s279_s2 = inlined_call_operand.vmem [shape: f32[8,4], index: 2, kind: output, shape index: {}]  }
   0x1   :  { %v44_v0 = vld [vmem:[%s277_s1 + $0xf8] sm:$0xff]  ;;  %v43_v2 = vld [vmem:[%s277_s1 + $0xf0] sm:$0xff]  ;;  %v42_v4 = vld [vmem:[%s277_s1 + $0xe8] sm:$0xff] }
   0x2   :  { %v28_v1 = vld [vmem:[%s277_s1 + $0x78] sm:$0xff]  ;;  %122 = vmatprep.subr.mxu0 %v44_v0  ;;  %v27_v3 = vld [vmem:[%s277_s1 + $0x70] sm:$0xff]  ;;  %v26_v5 = vld [vmem:[%s277_s1 + $0x68] sm:$0xff] }
   0x3   :  { %123 = vmatpush3.msra.mxu0 %v28_v1  ;;  %v41_v6 = vld [vmem:[%s277_s1 + $0xe0] sm:$0xff]  ;;  %v40_v8 = vld [vmem:[%s277_s1 + $0xd8] sm:$0xff]  ;;  %v39_v10 = vld [vmem:[%s277_s1 + $0xd0] sm:$0xff] }
   0x4   :  { %124 = vmatprep.subr.mxu0 %v43_v2  ;;  %v25_v7 = vld [vmem:[%s277_s1 + $0x60] sm:$0xff]  ;;  %v24_v9 = vld [vmem:[%s277_s1 + $0x58] sm:$0xff]  ;;  %v23_v11 = vld [vmem:[%s277_s1 + $0x50] sm:$0xff] }
   0x5   :  { %125 = vmatpush3.msra.mxu0 %v27_v3  ;;  %v38_v12 = vld [vmem:[%s277_s1 + $0xc8] sm:$0xff]  ;;  %v37_v15 = vld [vmem:[%s277_s1 + $0xc0] sm:$0xff]  ;;  %v36_v17 = vld [vmem:[%s277_s1 + $0xb8] sm:$0xff] }
   0x6   :  { %126 = vmatprep.subr.mxu0 %v42_v4  ;;  %v12_v13 = vld [vmem:[%s278_s0 + $0x8] sm:$0xff]  ;;  %v21_v16 = vld [vmem:[%s277_s1 + $0x40] sm:$0xff]  ;;  %v20_v18 = vld [vmem:[%s277_s1 + $0x38] sm:$0xff] }
   0x7   :  { %127 = vmatpush3.msra.mxu0 %v26_v5  ;;  %v22_v14 = vld [vmem:[%s277_s1 + $0x48] sm:$0xff]  ;;  %109 = vmatprep.mubr.f32.mxu0 %v12_v13  ;;  %v35_v19 = vld [vmem:[%s277_s1 + $0xb0] sm:$0xff]  ;;  %v33_v23 = vld [vmem:[%s277_s1 + $0xa0] sm:$0xff] }
   0x8   :  { %128 = vmatprep.subr.mxu0 %v41_v6  ;;  %v19_v20 = vld [vmem:[%s277_s1 + $0x30] sm:$0xff]  ;;  %v34_v21 = vld [vmem:[%s277_s1 + $0xa8] sm:$0xff]  ;;  %v17_v24 = vld [vmem:[%s277_s1 + $0x20] sm:$0xff] }
   0x9   :  { %129 = vmatpush3.msra.mxu0 %v25_v7  ;;  %v18_v22 = vld [vmem:[%s277_s1 + $0x28] sm:$0xff]  ;;  %v32_v25 = vld [vmem:[%s277_s1 + $0x98] sm:$0xff]  ;;  %v31_v27 = vld [vmem:[%s277_s1 + $0x90] sm:$0xff] }
   0xa   :  { %130 = vmatprep.subr.mxu0 %v40_v8  ;;  %v16_v26 = vld [vmem:[%s277_s1 + $0x18] sm:$0xff]  ;;  %v15_v28 = vld [vmem:[%s277_s1 + $0x10] sm:$0xff]  ;;  %v30_v29 = vld [vmem:[%s277_s1 + $0x88] sm:$0xff] }
   0xb   :  { %131 = vmatpush3.msra.mxu0 %v24_v9  ;;  %v14_v30 = vld [vmem:[%s277_s1 + $0x8] sm:$0xff]  ;;  %v29_v31 = vld [vmem:[%s277_s1 + $0x80] sm:$0xff] }
   0xc   :  { %132 = vmatprep.subr.mxu0 %v39_v10  ;;  %v13_v32 = vld [vmem:[%s277_s1] sm:$0xff] }
   0xd   :  { %133 = vmatpush3.msra.mxu0 %v23_v11  ;;  %v11_v33 = vld [vmem:[%s278_s0] sm:$0xff] }
   0xe   :  { %134 = vmatprep.subr.mxu0 %v38_v12 }
   0xf   :  { %135 = vmatpush3.msra.mxu0 %v22_v14 }
  0x10   :  { %136 = vmatprep.subr.mxu0 %v37_v15 }
  0x11   :  { %137 = vmatpush3.msra.mxu0 %v21_v16 }
  0x12   :  { %138 = vmatprep.subr.mxu0 %v36_v17 }
  0x13   :  { %139 = vmatpush3.msra.mxu0 %v20_v18 }
  0x14   :  { %140 = vmatprep.subr.mxu0 %v35_v19 }
  0x15   :  { %141 = vmatpush3.msra.mxu0 %v19_v20 }
  0x16   :  { %142 = vmatprep.subr.mxu0 %v34_v21 }
  0x17   :  { %143 = vmatpush3.msra.mxu0 %v18_v22 }
  0x18   :  { %144 = vmatprep.subr.mxu0 %v33_v23 }
  0x19   :  { %145 = vmatpush3.msra.mxu0 %v17_v24 }
  0x1a   :  { %146 = vmatprep.subr.mxu0 %v32_v25 }
  0x1b   :  { %147 = vmatpush3.msra.mxu0 %v16_v26 }
  0x1c   :  { %148 = vmatprep.subr.mxu0 %v31_v27 }
  0x1d   :  { %149 = vmatpush3.msra.mxu0 %v15_v28 }
  0x1e   :  { %150 = vmatprep.subr.mxu0 %v30_v29 }
  0x1f   :  { %151 = vmatpush3.msra.mxu0 %v14_v30 }
  0x20   :  { %152 = vmatprep.subr.mxu0 %v29_v31 }
  0x21   :  { %153 = vmatpush3.msra.mxu0 %v13_v32 }
  0x22   :  { %110 = vmatmul.mubr.f32.vlgmr.msra.gmra.mxu0 %v11_v33 }
  0xe2   :  { %v154_v34 = vpop.f32.mrf.mxu0 }
  0xe4   :  { %v155_v35 = vpop.f32.mrf.mxu0 }
  0xe5   :  { %v156_v36 = vadd.f32 %v155_v35, %v154_v34 }
  0xe7   :  { %v115_v37 = vmul.f32 0.015625, %v156_v36 }
  0xe9   :  { %117 = vst.msk [vmem:[%s279_s2] sm:$0xff] %vm116_vm0, %v115_v37 }

</bundles_post_ra>
